<compile_context>
chip_gen: v7x
topology: tpu7x:2x2x1
jax: 0.10.0
libtpu: 0.0.40
codegen_flags: <defaults>
</compile_context>

<pallas_src>
import functools

import jax
import jax.numpy as jnp
from jax.experimental import pallas as pl
from jax.experimental.pallas import tpu as pltpu

EPS = 1e-5
NEG_SLOPE = 0.2
_VMEM_LIMIT = 48 * 1024 * 1024  # headroom on v5e/v6e (128 MiB) and v7x (64 MiB physical)


def _round_up(x, m):
    return (x + m - 1) // m * m


def _conv_stats_kernel(p_ref, w_ref, y_ref, sum_ref, ssq_ref):
    """Conv-as-matmul (bf16 inputs -> f32 MXU acc) + per-channel sum / sum-of-squares."""
    i = pl.program_id(0)
    y = jnp.dot(p_ref[...], w_ref[...], preferred_element_type=jnp.float32)
    y_ref[...] = y  # pre-BN activation tile (read back by pass 2)

    @pl.when(i == 0)
    def _init():
        sum_ref[...] = jnp.zeros_like(sum_ref)
        ssq_ref[...] = jnp.zeros_like(ssq_ref)

    sum_ref[...] += jnp.sum(y, axis=0, keepdims=True)
    ssq_ref[...] += jnp.sum(y * y, axis=0, keepdims=True)


def _bn_act_kernel(scale_ref, shift_ref, y_ref, o_ref):
    """Fused BatchNorm affine (precomputed scale/shift) + LeakyReLU(0.2), per M-tile."""
    yn = y_ref[...] * scale_ref[...] + shift_ref[...]
    o_ref[...] = jnp.where(yn >= 0.0, yn, NEG_SLOPE * yn)


def _im2col_nhwc(x_nhwc, kh, kw, stride):
    """Extract stride-d patches. Returns (N*OH*OW, kh*kw*C), OH, OW."""
    N, H, W, C = x_nhwc.shape
    OH = (H - kh) // stride + 1
    OW = (W - kw) // stride + 1
    cols = []
    for i in range(kh):
        for j in range(kw):
            cols.append(x_nhwc[:, i:i + stride * OH:stride, j:j + stride * OW:stride, :])
    p = jnp.stack(cols, axis=3)  # (N, OH, OW, kh*kw, C)
    return p.reshape(N * OH * OW, kh * kw * C), OH, OW


@functools.partial(jax.jit, static_argnames=("stride", "padding", "tile_m"))
def down_block(x_nchw, conv_w, conv_b, bn_gamma, bn_beta,
               *, stride=2, padding=2, tile_m=512):
    """x_nchw: (N, Cin, H, W).  conv_w: (Cout, Cin, KH, KW) as in PyTorch."""
    del conv_b  # conv bias is cancelled exactly by training-mode BN mean subtraction
    N, Cin, H, W = x_nchw.shape
    Cout, _, KH, KW = conv_w.shape

    # Glue: NCHW -> NHWC, cast to bf16 (halves patch HBM bytes), spatial zero-pad, im2col.
    # TODO(synk): build the im2col patches per-tile inside the kernel from a halo input
    #             window (manual DMA) to remove the KH*KW x HBM inflation of the patches.
    x_nhwc = jnp.transpose(x_nchw, (0, 2, 3, 1)).astype(jnp.bfloat16)
    x_pad = jnp.pad(x_nhwc, ((0, 0), (padding, padding), (padding, padding), (0, 0)))
    patches, OH, OW = _im2col_nhwc(x_pad, KH, KW, stride)  # (M, K) bf16
    M, K = patches.shape

    # MXU / lane-friendly padding: K and Cout up to multiples of 128, M up to tile_m.
    KP = _round_up(K, 128)
    CoutP = _round_up(Cout, 128)
    tile_m = _round_up(max(8, min(tile_m, _round_up(M, 8))), 8)
    M_pad = _round_up(M, tile_m)
    num_tiles = M_pad // tile_m

    patches = jnp.pad(patches, ((0, M_pad - M), (0, KP - K)))
    # Weight (Cout, Cin, KH, KW) -> (KH, KW, Cin, Cout) -> (K, Cout), matching patch order.
    w_mat = jnp.transpose(conv_w, (2, 3, 1, 0)).reshape(K, Cout).astype(jnp.bfloat16)
    w_mat = jnp.pad(w_mat, ((0, KP - K), (0, CoutP - Cout)))
    g_row = jnp.pad(bn_gamma.astype(jnp.float32), (0, CoutP - Cout)).reshape(1, CoutP)
    b_row = jnp.pad(bn_beta.astype(jnp.float32), (0, CoutP - Cout)).reshape(1, CoutP)

    # ---- pass 1: conv matmul per tile + global per-channel sum / sumsq ----
    y_flat, ch_sum, ch_ssq = pl.pallas_call(
        _conv_stats_kernel,
        out_shape=(
            jax.ShapeDtypeStruct((M_pad, CoutP), jnp.float32),
            jax.ShapeDtypeStruct((1, CoutP), jnp.float32),
            jax.ShapeDtypeStruct((1, CoutP), jnp.float32),
        ),
        grid=(num_tiles,),
        in_specs=[
            pl.BlockSpec((tile_m, KP), lambda i: (i, 0)),
            pl.BlockSpec((KP, CoutP), lambda i: (0, 0)),   # weights stay resident in VMEM
        ],
        out_specs=(
            pl.BlockSpec((tile_m, CoutP), lambda i: (i, 0)),
            pl.BlockSpec((1, CoutP), lambda i: (0, 0)),    # resident accumulator
            pl.BlockSpec((1, CoutP), lambda i: (0, 0)),    # resident accumulator
        ),
        compiler_params=pltpu.CompilerParams(
            dimension_semantics=("arbitrary",),
            vmem_limit_bytes=_VMEM_LIMIT),
    )(patches, w_mat)

    # Fused per-channel scale/shift computed once on the tiny (1, CoutP) stats row.
    # Padded rows contribute y == 0 (zero patches, no bias), so dividing by the true M
    # yields exact global batch statistics.  Padded channels have gamma == 0 -> scale == 0.
    inv_m = jnp.float32(1.0 / M)
    mean = ch_sum * inv_m
    var = jnp.maximum(ch_ssq * inv_m - mean * mean, 0.0)   # biased variance (training mode)
    scale = g_row * jax.lax.rsqrt(var + EPS)
    shift = b_row - mean * scale

    # ---- pass 2: normalize + LeakyReLU, tiled over M, aliased onto the y buffer ----
    out_flat = pl.pallas_call(
        _bn_act_kernel,
        out_shape=jax.ShapeDtypeStruct((M_pad, CoutP), jnp.float32),
        grid=(num_tiles,),
        in_specs=[
            pl.BlockSpec((1, CoutP), lambda i: (0, 0)),
            pl.BlockSpec((1, CoutP), lambda i: (0, 0)),
            pl.BlockSpec((tile_m, CoutP), lambda i: (i, 0)),
        ],
        out_specs=pl.BlockSpec((tile_m, CoutP), lambda i: (i, 0)),
        input_output_aliases={2: 0},
        compiler_params=pltpu.CompilerParams(
            dimension_semantics=("parallel",),
            vmem_limit_bytes=_VMEM_LIMIT),
    )(scale, shift, y_flat)

    # (M_pad, CoutP) -> (N, OH, OW, Cout) -> NCHW
    out = out_flat[:M, :Cout].reshape(N, OH, OW, Cout)
    return jnp.transpose(out, (0, 3, 1, 2))


def _reference(x_nchw, conv_w, conv_b, bn_gamma, bn_beta,
               *, stride=2, padding=2, matmul_dtype=jnp.float32):
    """Pure-JAX reference matching the PyTorch training-mode forward."""
    y = jax.lax.conv_general_dilated(
        x_nchw.astype(matmul_dtype), conv_w.astype(matmul_dtype),
        window_strides=(stride, stride),
        padding=((padding, padding), (padding, padding)),
        dimension_numbers=("NCHW", "OIHW", "NCHW"),
        preferred_element_type=jnp.float32)
    y = y + conv_b.reshape(1, -1, 1, 1).astype(jnp.float32)
    mean = jnp.mean(y, axis=(0, 2, 3), keepdims=True)
    var = jnp.mean((y - mean) ** 2, axis=(0, 2, 3), keepdims=True)
    yn = (y - mean) * jax.lax.rsqrt(var + EPS)
    yn = yn * bn_gamma.reshape(1, -1, 1, 1) + bn_beta.reshape(1, -1, 1, 1)
    return jnp.where(yn >= 0.0, yn, NEG_SLOPE * yn)


if __name__ == "__main__":
    # Small shapes: batch=2, in_channel=4, out_channel=8, spatial=16 -> output 8x8.
    N, Cin, Cout, H, W, KH, KW = 2, 4, 8, 16, 16, 5, 5

    key = jax.random.PRNGKey(0)
    k_x, k_w, k_b, k_g, k_be = jax.random.split(key, 5)
    x = jax.random.normal(k_x, (N, Cin, H, W), dtype=jnp.float32)
    conv_w = jax.random.normal(k_w, (Cout, Cin, KH, KW), dtype=jnp.float32) * 0.1
    conv_b = jax.random.normal(k_b, (Cout,), dtype=jnp.float32) * 0.1
    bn_gamma = 1.0 + 0.1 * jax.random.normal(k_g, (Cout,), dtype=jnp.float32)
    bn_beta = 0.1 * jax.random.normal(k_be, (Cout,), dtype=jnp.float32)

    # tile_m=64 -> 2 M-tiles at this toy shape, exercising cross-tile stats accumulation.
    out = down_block(x, conv_w, conv_b, bn_gamma, bn_beta, tile_m=64)
    out = jax.block_until_ready(out)

    assert out.shape == (N, Cout, H // 2, W // 2), out.shape

    # Tight check vs. a reference using the same bf16 matmul inputs (f32 accumulation).
    ref_bf16 = _reference(x, conv_w, conv_b, bn_gamma, bn_beta, matmul_dtype=jnp.bfloat16)
    assert jnp.allclose(out, ref_bf16, atol=2e-3, rtol=2e-3), \
        float(jnp.max(jnp.abs(out - ref_bf16)))

    # Sanity check vs. the full-f32 PyTorch-equivalent forward (bf16 matmul tolerance).
    ref_f32 = _reference(x, conv_w, conv_b, bn_gamma, bn_beta, matmul_dtype=jnp.float32)
    assert jnp.allclose(out, ref_f32, atol=5e-2, rtol=5e-2), \
        float(jnp.max(jnp.abs(out - ref_f32)))

    print("KERNEL_OK")
</pallas_src>

<mosaic_0001>
module attributes {stable_mosaic.version = 11 : i64} {
  func.func @_bn_act_kernel(%arg0: i32, %arg1: memref<1x128xf32, #tpu.memory_space<vmem>>, %arg2: memref<1x128xf32, #tpu.memory_space<vmem>>, %arg3: memref<64x128xf32, #tpu.memory_space<vmem>>, %arg4: memref<64x128xf32, #tpu.memory_space<vmem>>) attributes {dimension_semantics = [#tpu.dimension_semantics<parallel>], iteration_bounds = array<i64: 2>, scalar_prefetch = 0 : i64, scratch_operands = 0 : i64, tpu.core_type = #tpu.core_type<tc>, window_params = [{pipeline_mode = #tpu.pipeline_mode<synchronous>, transform_indices = @transform_0, window_bounds = array<i64: 1, 128>}, {pipeline_mode = #tpu.pipeline_mode<synchronous>, transform_indices = @transform_1, window_bounds = array<i64: 1, 128>}, {transform_indices = @transform_2, window_bounds = array<i64: 64, 128>}, {transform_indices = @transform_3, window_bounds = array<i64: 64, 128>}]} {
    %c0 = arith.constant 0 : index
    %c0_0 = arith.constant 0 : index
    %0 = vector.load %arg3[%c0, %c0_0] : memref<64x128xf32, #tpu.memory_space<vmem>>, vector<64x128xf32>
    %c0_1 = arith.constant 0 : index
    %c0_2 = arith.constant 0 : index
    %1 = vector.load %arg1[%c0_1, %c0_2] : memref<1x128xf32, #tpu.memory_space<vmem>>, vector<1x128xf32>
    %2 = vector.broadcast %1 : vector<1x128xf32> to vector<64x128xf32>
    %3 = arith.mulf %0, %2 : vector<64x128xf32>
    %c0_3 = arith.constant 0 : index
    %c0_4 = arith.constant 0 : index
    %4 = vector.load %arg2[%c0_3, %c0_4] : memref<1x128xf32, #tpu.memory_space<vmem>>, vector<1x128xf32>
    %5 = vector.broadcast %4 : vector<1x128xf32> to vector<64x128xf32>
    %6 = arith.addf %3, %5 : vector<64x128xf32>
    %cst = arith.constant 0.000000e+00 : f32
    %7 = vector.broadcast %cst : f32 to vector<64x128xf32>
    %8 = arith.cmpf oge, %6, %7 : vector<64x128xf32>
    %cst_5 = arith.constant 2.000000e-01 : f32
    %9 = vector.broadcast %cst_5 : f32 to vector<64x128xf32>
    %10 = arith.mulf %9, %6 : vector<64x128xf32>
    %11 = arith.select %8, %6, %10 : vector<64x128xi1>, vector<64x128xf32>
    %c0_6 = arith.constant 0 : index
    %c0_7 = arith.constant 0 : index
    %12 = vector.load %arg4[%c0_6, %c0_7] : memref<64x128xf32, #tpu.memory_space<vmem>>, vector<64x128xf32>
    tpu.vector_store %arg4[%c0_6, %c0_7], %11 {strides = array<i32>} : memref<64x128xf32, #tpu.memory_space<vmem>>, vector<64x128xf32>,
    return
  }
  func.func @transform_0(%arg0: i32) -> (i32, i32) {
    %c0_i32 = arith.constant 0 : i32
    %c0_i32_0 = arith.constant 0 : i32
    %c0_i32_1 = arith.constant 0 : i32
    return %c0_i32, %c0_i32_0 : i32, i32
  }
  func.func @transform_1(%arg0: i32) -> (i32, i32) {
    %c0_i32 = arith.constant 0 : i32
    %c0_i32_0 = arith.constant 0 : i32
    %c0_i32_1 = arith.constant 0 : i32
    return %c0_i32, %c0_i32_0 : i32, i32
  }
  func.func @transform_2(%arg0: i32) -> (i32, i32) {
    %c0_i32 = arith.constant 0 : i32
    %c0_i32_0 = arith.constant 0 : i32
    return %arg0, %c0_i32 : i32, i32
  }
  func.func @transform_3(%arg0: i32) -> (i32, i32) {
    %c0_i32 = arith.constant 0 : i32
    %c0_i32_0 = arith.constant 0 : i32
    return %arg0, %c0_i32 : i32, i32
  }
}

module attributes {stable_mosaic.version = 11 : i64} {
  func.func @_conv_stats_kernel(%arg0: i32, %arg1: memref<64x128xbf16, #tpu.memory_space<vmem>>, %arg2: memref<128x128xbf16, #tpu.memory_space<vmem>>, %arg3: memref<64x128xf32, #tpu.memory_space<vmem>>, %arg4: memref<1x128xf32, #tpu.memory_space<vmem>>, %arg5: memref<1x128xf32, #tpu.memory_space<vmem>>) attributes {dimension_semantics = [#tpu.dimension_semantics<arbitrary>], iteration_bounds = array<i64: 2>, scalar_prefetch = 0 : i64, scratch_operands = 0 : i64, tpu.core_type = #tpu.core_type<tc>, window_params = [{transform_indices = @transform_0, window_bounds = array<i64: 64, 128>}, {pipeline_mode = #tpu.pipeline_mode<synchronous>, transform_indices = @transform_1, window_bounds = array<i64: 128, 128>}, {transform_indices = @transform_2, window_bounds = array<i64: 64, 128>}, {pipeline_mode = #tpu.pipeline_mode<synchronous>, transform_indices = @transform_3, window_bounds = array<i64: 1, 128>}, {pipeline_mode = #tpu.pipeline_mode<synchronous>, transform_indices = @transform_4, window_bounds = array<i64: 1, 128>}]} {
    %c0 = arith.constant 0 : index
    %c0_0 = arith.constant 0 : index
    %0 = vector.load %arg1[%c0, %c0_0] : memref<64x128xbf16, #tpu.memory_space<vmem>>, vector<64x128xbf16>
    %c0_1 = arith.constant 0 : index
    %c0_2 = arith.constant 0 : index
    %1 = vector.load %arg2[%c0_1, %c0_2] : memref<128x128xbf16, #tpu.memory_space<vmem>>, vector<128x128xbf16>
    %cst = arith.constant dense<0.000000e+00> : vector<64x128xf32>
    %2 = tpu.matmul %0, %1, %cst {dimension_numbers = #tpu.dot_dimension_numbers<[1], [0], [0], [1], [0, 0, 1, 1], [], []>} : vector<64x128xbf16>, vector<128x128xbf16>, vector<64x128xf32> -> vector<64x128xf32>
    %c0_3 = arith.constant 0 : index
    %c0_4 = arith.constant 0 : index
    %3 = vector.load %arg3[%c0_3, %c0_4] : memref<64x128xf32, #tpu.memory_space<vmem>>, vector<64x128xf32>
    tpu.vector_store %arg3[%c0_3, %c0_4], %2 {strides = array<i32>} : memref<64x128xf32, #tpu.memory_space<vmem>>, vector<64x128xf32>,
    %c0_i32 = arith.constant 0 : i32
    %4 = arith.cmpi eq, %arg0, %c0_i32 : i32
    %5 = arith.extui %4 : i1 to i32
    %c0_i32_5 = arith.constant 0 : i32
    %6 = arith.cmpi ne, %5, %c0_i32_5 : i32
    scf.if %6 {
      %cst_16 = arith.constant 0.000000e+00 : f32
      %18 = vector.broadcast %cst_16 : f32 to vector<1x128xf32>
      %c0_17 = arith.constant 0 : index
      %c0_18 = arith.constant 0 : index
      %19 = vector.load %arg4[%c0_17, %c0_18] : memref<1x128xf32, #tpu.memory_space<vmem>>, vector<1x128xf32>
      tpu.vector_store %arg4[%c0_17, %c0_18], %18 {strides = array<i32>} : memref<1x128xf32, #tpu.memory_space<vmem>>, vector<1x128xf32>,
      %cst_19 = arith.constant 0.000000e+00 : f32
      %20 = vector.broadcast %cst_19 : f32 to vector<1x128xf32>
      %c0_20 = arith.constant 0 : index
      %c0_21 = arith.constant 0 : index
      %21 = vector.load %arg5[%c0_20, %c0_21] : memref<1x128xf32, #tpu.memory_space<vmem>>, vector<1x128xf32>
      tpu.vector_store %arg5[%c0_20, %c0_21], %20 {strides = array<i32>} : memref<1x128xf32, #tpu.memory_space<vmem>>, vector<1x128xf32>,
    } else {
    }
    %c0_6 = arith.constant 0 : index
    %c0_7 = arith.constant 0 : index
    %7 = vector.load %arg4[%c0_6, %c0_7] : memref<1x128xf32, #tpu.memory_space<vmem>>, vector<1x128xf32>
    %cst_8 = arith.constant dense<0.000000e+00> : vector<128xf32>
    %8 = vector.multi_reduction <add>, %2, %cst_8 [0] : vector<64x128xf32> to vector<128xf32>
    %9 = vector.shape_cast %8 : vector<128xf32> to vector<1x128xf32>
    %10 = arith.addf %7, %9 : vector<1x128xf32>
    %c0_9 = arith.constant 0 : index
    %c0_10 = arith.constant 0 : index
    %11 = vector.load %arg4[%c0_9, %c0_10] : memref<1x128xf32, #tpu.memory_space<vmem>>, vector<1x128xf32>
    tpu.vector_store %arg4[%c0_9, %c0_10], %10 {strides = array<i32>} : memref<1x128xf32, #tpu.memory_space<vmem>>, vector<1x128xf32>,
    %c0_11 = arith.constant 0 : index
    %c0_12 = arith.constant 0 : index
    %12 = vector.load %arg5[%c0_11, %c0_12] : memref<1x128xf32, #tpu.memory_space<vmem>>, vector<1x128xf32>
    %13 = arith.mulf %2, %2 : vector<64x128xf32>
    %cst_13 = arith.constant dense<0.000000e+00> : vector<128xf32>
    %14 = vector.multi_reduction <add>, %13, %cst_13 [0] : vector<64x128xf32> to vector<128xf32>
    %15 = vector.shape_cast %14 : vector<128xf32> to vector<1x128xf32>
    %16 = arith.addf %12, %15 : vector<1x128xf32>
    %c0_14 = arith.constant 0 : index
    %c0_15 = arith.constant 0 : index
    %17 = vector.load %arg5[%c0_14, %c0_15] : memref<1x128xf32, #tpu.memory_space<vmem>>, vector<1x128xf32>
    tpu.vector_store %arg5[%c0_14, %c0_15], %16 {strides = array<i32>} : memref<1x128xf32, #tpu.memory_space<vmem>>, vector<1x128xf32>,
    return
  }
  func.func @transform_0(%arg0: i32) -> (i32, i32) {
    %c0_i32 = arith.constant 0 : i32
    %c0_i32_0 = arith.constant 0 : i32
    return %arg0, %c0_i32 : i32, i32
  }
  func.func @transform_1(%arg0: i32) -> (i32, i32) {
    %c0_i32 = arith.constant 0 : i32
    %c0_i32_0 = arith.constant 0 : i32
    %c0_i32_1 = arith.constant 0 : i32
    return %c0_i32, %c0_i32_0 : i32, i32
  }
  func.func @transform_2(%arg0: i32) -> (i32, i32) {
    %c0_i32 = arith.constant 0 : i32
    %c0_i32_0 = arith.constant 0 : i32
    return %arg0, %c0_i32 : i32, i32
  }
  func.func @transform_3(%arg0: i32) -> (i32, i32) {
    %c0_i32 = arith.constant 0 : i32
    %c0_i32_0 = arith.constant 0 : i32
    %c0_i32_1 = arith.constant 0 : i32
    return %c0_i32, %c0_i32_0 : i32, i32
  }
  func.func @transform_4(%arg0: i32) -> (i32, i32) {
    %c0_i32 = arith.constant 0 : i32
    %c0_i32_0 = arith.constant 0 : i32
    %c0_i32_1 = arith.constant 0 : i32
    return %c0_i32, %c0_i32_0 : i32, i32
  }
}

</mosaic_0001>

<bundles_post_ra>
// kernel: down_block.3
= control target key start
LH: loop header
LB: loop body
LE: loop exit
PB: predicated region body
PF: predicated region fallthrough
CT: control target
= control target key end

     0   :  { %s349_s12 = smov 0   ;;  %s382_s0 = inlined_call_operand.vmem [shape: f32[1,128], index: 0, kind: input, shape index: {}]   ;;  %s383_s1 = inlined_call_operand.vmem [shape: f32[1,128], index: 1, kind: input, shape index: {}]   ;;  %s384_s2 = inlined_call_operand.vmem [shape: f32[128,128], index: 2, kind: input, shape index: {}, may-alias: {2,3}]   ;;  %s385_s3 = inlined_call_operand.vmem [shape: f32[128,128], index: 3, kind: output, shape index: {}, may-alias: {2,3}]  }
   0x1 LB: > { %s300_s13 = sadd.s32 4294967295, %s327_s12   ;;  %p304_p0 = scmp.ge.s32.totalorder %s327_s12, 1  ;;  %s327_s12 = sphi %s349_s12, %s13_s12  }
   0x2   : > { %p138_p1 = scmp.lt.s32.totalorder %s327_s12, 3 }
   0x4   : > { %p139_p2 = pnand %p304_p0, %p138_p1 }
   0x5   : > { %s305_s14 = sshll.u32 (!%p139_p2), %s300_s13, 3  ;;  %v309_v0 = vld [vmem:[%s382_s0] ss:$0 sm:$0xff] (!%p139_p2) }
   0x6   : > { %142 = sbr.rel (%p139_p2) target bundleno = 32 (0x20), region = 32  ;;  %p163_p3 = scmp.lt.s32.totalorder (!%p139_p2), %s305_s14, 15  ;;  %v310_v1 = vld [vmem:[%s383_s1] ss:$0 sm:$0xff] (!%p139_p2) }
   0xd   : > { %s387_s14 = smov (!%p163_p3, %s305_s14), 15 }
   0xe   : > { %s306_s15 = sshll.u32 %s387_s14, 3 }
   0xf   : > { %s166_s20 = scalar_lea.vmem %s384_s2, %s306_s15  ;;  %s369_s25 = scalar_lea.vmem %s385_s3, %s306_s15 }
  0x10   : > { %v174_v2 = vld [vmem:[%s166_s20] sm:$0xff]  ;;  %v175_v3 = vld [vmem:[%s166_s20 + $0x8] sm:$0xff]  ;;  %v176_v4 = vld [vmem:[%s166_s20 + $0x10] sm:$0xff] }
  0x11   : > { %v177_v5 = vld [vmem:[%s166_s20 + $0x18] sm:$0xff]  ;;  %v178_v6 = vld [vmem:[%s166_s20 + $0x20] sm:$0xff]  ;;  %v179_v7 = vld [vmem:[%s166_s20 + $0x28] sm:$0xff]  ;;  %v189_v8 = vmul.f32 %v309_v0, %v174_v2  ;;  %v190_v9 = vmul.f32 %v309_v0, %v175_v3  ;;  %v191_v10 = vmul.f32 %v309_v0, %v176_v4 }
  0x12   : > { %v180_v11 = vld [vmem:[%s166_s20 + $0x30] sm:$0xff]  ;;  %v181_v12 = vld [vmem:[%s166_s20 + $0x38] sm:$0xff]  ;;  %v192_v13 = vmul.f32 %v309_v0, %v177_v5  ;;  %v193_v14 = vmul.f32 %v309_v0, %v178_v6  ;;  %v194_v15 = vmul.f32 %v309_v0, %v179_v7 }
  0x13   : > { %v204_v16 = vadd.f32 %v310_v1, %v189_v8  ;;  %v205_v17 = vadd.f32 %v310_v1, %v190_v9  ;;  %v206_v18 = vadd.f32 %v310_v1, %v191_v10  ;;  %v195_v19 = vmul.f32 %v309_v0, %v180_v11 }
  0x14   : > { %v207_v20 = vadd.f32 %v310_v1, %v192_v13  ;;  %v208_v21 = vadd.f32 %v310_v1, %v193_v14  ;;  %v209_v22 = vadd.f32 %v310_v1, %v194_v15  ;;  %v196_v23 = vmul.f32 %v309_v0, %v181_v12 }
  0x15   : > { %vm212_vm0 = vcmp.ge.f32.partialorder %v204_v16, 0.0  ;;  %v220_v24 = vmul.f32 0.2, %v204_v16  ;;  %vm213_vm1 = vcmp.ge.f32.partialorder %v205_v17, 0.0  ;;  %v221_v25 = vmul.f32 0.2, %v205_v17 }
  0x16   : > { %vm214_vm2 = vcmp.ge.f32.partialorder %v206_v18, 0.0  ;;  %v222_v26 = vmul.f32 0.2, %v206_v18  ;;  %vm215_vm3 = vcmp.ge.f32.partialorder %v207_v20, 0.0  ;;  %v223_v27 = vmul.f32 0.2, %v207_v20 }
  0x17   : > { %v228_v28 = vsel %vm212_vm0, %v204_v16, %v220_v24  ;;  %v229_v29 = vsel %vm213_vm1, %v205_v17, %v221_v25  ;;  %vm216_vm4 = vcmp.ge.f32.partialorder %v208_v21, 0.0  ;;  %v224_v30 = vmul.f32 0.2, %v208_v21 }
  0x18   : > { %236 = vst [vmem:[%s369_s25] sm:$0xff] %v228_v28  ;;  %237 = vst [vmem:[%s369_s25 + $0x8] sm:$0xff] %v229_v29  ;;  %v230_v31 = vsel %vm214_vm2, %v206_v18, %v222_v26  ;;  %v231_v32 = vsel %vm215_vm3, %v207_v20, %v223_v27  ;;  %vm217_vm5 = vcmp.ge.f32.partialorder %v209_v22, 0.0  ;;  %v225_v33 = vmul.f32 0.2, %v209_v22 }
  0x19   : > { %238 = vst [vmem:[%s369_s25 + $0x10] sm:$0xff] %v230_v31  ;;  %239 = vst [vmem:[%s369_s25 + $0x18] sm:$0xff] %v231_v32  ;;  %v232_v34 = vsel %vm216_vm4, %v208_v21, %v224_v30  ;;  %v210_v35 = vadd.f32 %v310_v1, %v195_v19  ;;  %v211_v36 = vadd.f32 %v310_v1, %v196_v23 }
  0x1a   : > { %240 = vst [vmem:[%s369_s25 + $0x20] sm:$0xff] %v232_v34  ;;  %v233_v37 = vsel %vm217_vm5, %v209_v22, %v225_v33 }
  0x1b   : > { %241 = vst [vmem:[%s369_s25 + $0x28] sm:$0xff] %v233_v37  ;;  %vm218_vm6 = vcmp.ge.f32.partialorder %v210_v35, 0.0  ;;  %v226_v38 = vmul.f32 0.2, %v210_v35  ;;  %vm219_vm7 = vcmp.ge.f32.partialorder %v211_v36, 0.0 }
  0x1c   : > { %v227_v39 = vmul.f32 0.2, %v211_v36 }
  0x1d   : > { %v234_v40 = vsel %vm218_vm6, %v210_v35, %v226_v38 }
  0x1e   : > { %v235_v41 = vsel %vm219_vm7, %v211_v36, %v227_v39  ;;  %242 = vst [vmem:[%s369_s25 + $0x30] sm:$0xff] %v234_v40 }
  0x1f   : > { %243 = vst [vmem:[%s369_s25 + $0x38] sm:$0xff] %v235_v41 }
  0x20 PF: > { %s13_s12 = sadd.s32 1, %s327_s12  }
  0x21   : > { %p10_p4 = scmp.ge.s32.totalorder %s13_s12, 4  }
  0x23   :  { %12 = sbr.rel (!%p10_p4) target bundleno = 1 (0x1), region = 62 }

// kernel: down_block.2
= control target key start
LH: loop header
LB: loop body
LE: loop exit
PB: predicated region body
PF: predicated region fallthrough
CT: control target
= control target key end

     0   :  { %s611_s15 = smov 0   ;;  %s684_s0 = inlined_call_operand.vmem [shape: bf16[128,128], index: 0, kind: input, shape index: {}]   ;;  %s685_s1 = inlined_call_operand.vmem [shape: bf16[128,128], index: 1, kind: input, shape index: {}]   ;;  %s686_s2 = inlined_call_operand.vmem [shape: f32[128,128], index: 2, kind: output, shape index: {0}]   ;;  %s687_s3 = inlined_call_operand.vmem [shape: f32[1,128], index: 3, kind: output, shape index: {1}]   ;;  %s688_s4 = inlined_call_operand.vmem [shape: f32[1,128], index: 4, kind: output, shape index: {2}]  }
   0x1 LB: > { %s480_s16 = sadd.s32 4294967295, %s583_s15   ;;  %p484_p0 = scmp.ge.s32.totalorder %s583_s15, 1  ;;  %s583_s15 = sphi %s611_s15, %s15_s15  }
   0x2   : > { %p158_p1 = scmp.lt.s32.totalorder %s583_s15, 3 }
   0x4   : > { %p159_p2 = pnand %p484_p0, %p158_p1 }
   0x5   : > { %v565_v0 = vld [vmem:[%s685_s1] sm:$0xff] (!%p159_p2)   ;;  %s485_s19 = sshll.u32 (!%p159_p2), %s480_s16, 3  ;;  %v566_v1 = vld [vmem:[%s685_s1 + $0x8] sm:$0xff] (!%p159_p2)   ;;  %v567_v2 = vld [vmem:[%s685_s1 + $0x10] sm:$0xff] (!%p159_p2)   ;;  %p501_p4 = scmp.ne.s32.totalorder (!%p159_p2), %s480_s16, 0 }
   0x6   : > { %162 = sbr.rel (%p159_p2) target bundleno = 285 (0x11d), region = 28  ;;  %p185_p3 = scmp.lt.s32.totalorder (!%p159_p2), %s485_s19, 15  ;;  %516 = vmatprep.subr.bf16.mxu0 (!%p159_p2), %v565_v0  ;;  %540 = vmatprep.subr.bf16.mxu1 (!%p159_p2), %v565_v0  ;;  %v568_v3 = vld [vmem:[%s685_s1 + $0x18] sm:$0xff] (!%p159_p2)   ;;  %v569_v6 = vld [vmem:[%s685_s1 + $0x20] sm:$0xff] (!%p159_p2)   ;;  %v570_v7 = vld [vmem:[%s685_s1 + $0x28] sm:$0xff] (!%p159_p2)  }
   0x7   : > { %517 = vmatpush3.bf16.msra.mxu0 (!%p159_p2), %v565_v0  ;;  %548 = vmatpush3.bf16.msra.mxu1 (!%p159_p2), %v565_v0  ;;  %v571_v8 = vld [vmem:[%s685_s1 + $0x30] sm:$0xff] (!%p159_p2)   ;;  %v572_v9 = vld [vmem:[%s685_s1 + $0x38] sm:$0xff] (!%p159_p2)  }
   0x8   : > { %518 = vmatprep.subr.bf16.mxu0 (!%p159_p2), %v566_v1  ;;  %541 = vmatprep.subr.bf16.mxu1 (!%p159_p2), %v566_v1 }
   0xb   : > { %519 = vmatpush3.bf16.msra.mxu0 (!%p159_p2), %v566_v1  ;;  %549 = vmatpush3.bf16.msra.mxu1 (!%p159_p2), %v566_v1 }
   0xc   : > { %520 = vmatprep.subr.bf16.mxu0 (!%p159_p2), %v567_v2  ;;  %542 = vmatprep.subr.bf16.mxu1 (!%p159_p2), %v567_v2 }
   0xd   : > { %s690_s19 = smov (!%p185_p3, %s485_s19), 15  ;;  %v585_v20 = vmov (!%p501_p4), 0.0  }
   0xe   : > { %s486_s24 = sshll.u32 %s690_s19, 2  ;;  %s488_s12 = sshll.u32 %s690_s19, 3  ;;  %370 = vst [vmem:[%s687_s3] sm:$0x1] (!%p501_p4), %v585_v20  ;;  %371 = vst [vmem:[%s688_s4] sm:$0x1] (!%p501_p4), %v585_v20 }
   0xf   : > { %s636_s27 = scalar_lea.vmem %s684_s0, %s486_s24  ;;  %521 = vmatpush3.bf16.msra.mxu0 %v567_v2  ;;  %550 = vmatpush3.bf16.msra.mxu1 %v567_v2  ;;  %s194_s17 = scalar_lea.vmem %s686_s2, %s488_s12 }
  0x10   : > { %v573_v4 = vld [vmem:[%s636_s27] sm:$0xff]   ;;  %v574_v5 = vld [vmem:[%s636_s27 + $0x10] sm:$0xff]   ;;  %522 = vmatprep.subr.bf16.mxu0 %v568_v3  ;;  %543 = vmatprep.subr.bf16.mxu1 %v568_v3  ;;  %v575_v10 = vld [vmem:[%s636_s27 + $0x8] sm:$0xff]  }
  0x11   : > { %532 = vmatprep.mubr.bf16.mxu0 %v573_v4  ;;  %536 = vmatprep.mubr.bf16.mxu1 %v574_v5  ;;  %v576_v11 = vld [vmem:[%s636_s27 + $0x18] sm:$0xff]  }
  0x13   : > { %523 = vmatpush3.bf16.msra.mxu0 %v568_v3  ;;  %551 = vmatpush3.bf16.msra.mxu1 %v568_v3 }
  0x14   : > { %524 = vmatprep.subr.bf16.mxu0 %v569_v6  ;;  %544 = vmatprep.subr.bf16.mxu1 %v569_v6 }
  0x17   : > { %525 = vmatpush3.bf16.msra.mxu0 %v569_v6  ;;  %552 = vmatpush3.bf16.msra.mxu1 %v569_v6 }
  0x18   : > { %526 = vmatprep.subr.bf16.mxu0 %v570_v7  ;;  %545 = vmatprep.subr.bf16.mxu1 %v570_v7 }
  0x1b   : > { %527 = vmatpush3.bf16.msra.mxu0 %v570_v7  ;;  %553 = vmatpush3.bf16.msra.mxu1 %v570_v7 }
  0x1c   : > { %528 = vmatprep.subr.bf16.mxu0 %v571_v8  ;;  %546 = vmatprep.subr.bf16.mxu1 %v571_v8 }
  0x1f   : > { %529 = vmatpush3.bf16.msra.mxu0 %v571_v8  ;;  %554 = vmatpush3.bf16.msra.mxu1 %v571_v8 }
  0x20   : > { %530 = vmatprep.subr.bf16.mxu0 %v572_v9  ;;  %547 = vmatprep.subr.bf16.mxu1 %v572_v9 }
  0x23   : > { %531 = vmatpush3.bf16.msra.mxu0 %v572_v9  ;;  %555 = vmatpush3.bf16.msra.mxu1 %v572_v9 }
  0x26   : > { %533 = vmatmul.mubr.bf16.vlgmr.msra.gmra.mrb[0].mxu0 %v575_v10  ;;  %537 = vmatmul.mubr.bf16.vlgmr.msra.gmra.mrb[0].mxu1 %v576_v11 }
  0xf7   : > { %369 = sbr.rel (%p501_p4) target bundleno = 254 (0xfe), region = 32 }
  0xf9   : > { %v534_v12 = vpop.f32.mrb[0].mxu0  ;;  %v538_v13 = vpop.f32.mrb[0].mxu1 }
  0xfa   : > { %360 = vst [vmem:[%s194_s17 + $0x10] sm:$0xff] %v534_v12  ;;  %364 = vst [vmem:[%s194_s17 + $0x30] sm:$0xff] %v538_v13  ;;  %v327_v14 = vpop.f32.mrb[1].mxu0  ;;  %v343_v15 = vpop.f32.mrb[1].mxu1 }
  0xfb   : > { %358 = vst [vmem:[%s194_s17] sm:$0xff] %v327_v14  ;;  %362 = vst [vmem:[%s194_s17 + $0x20] sm:$0xff] %v343_v15  ;;  %v535_v16 = vpop.f32.mrb[2].mxu0  ;;  %v539_v17 = vpop.f32.mrb[2].mxu1 }
  0xfc   : > { %361 = vst [vmem:[%s194_s17 + $0x18] sm:$0xff] %v535_v16  ;;  %365 = vst [vmem:[%s194_s17 + $0x38] sm:$0xff] %v539_v17  ;;  %v330_v18 = vpop.f32.mrb[3].mxu0  ;;  %v346_v19 = vpop.f32.mrb[3].mxu1 }
  0xfd   : > { %359 = vst [vmem:[%s194_s17 + $0x8] sm:$0xff] %v330_v18  ;;  %363 = vst [vmem:[%s194_s17 + $0x28] sm:$0xff] %v346_v19 }
  0xfe PF: > { %v373_v21 = vadd.f32 %v330_v18, %v327_v14  ;;  %v389_v22 = vmul.f32 %v327_v14, %v327_v14  ;;  %v390_v23 = vmul.f32 %v330_v18, %v330_v18  ;;  %v391_v24 = vmul.f32 %v534_v12, %v534_v12  ;;  %v372_v52 = vld [vmem:[%s687_s3] sm:$0x1] }
  0xff   : > { %v392_v26 = vmul.f32 %v535_v16, %v535_v16  ;;  %v393_v29 = vmul.f32 %v343_v15, %v343_v15  ;;  %v394_v32 = vmul.f32 %v346_v19, %v346_v19  ;;  %v395_v35 = vmul.f32 %v538_v13, %v538_v13  ;;  %v388_v55 = vld [vmem:[%s688_s4] sm:$0x1] }
 0x100   : > { %v374_v25 = vadd.f32 %v534_v12, %v373_v21  ;;  %v397_v27 = vadd.f32 %v390_v23, %v389_v22  ;;  %v396_v38 = vmul.f32 %v539_v17, %v539_v17 }
 0x102   : > { %v375_v28 = vadd.f32 %v535_v16, %v374_v25  ;;  %v398_v30 = vadd.f32 %v397_v27, %v391_v24 }
 0x104   : > { %v376_v31 = vadd.f32 %v375_v28, %v343_v15  ;;  %v399_v33 = vadd.f32 %v398_v30, %v392_v26 }
 0x106   : > { %v377_v34 = vadd.f32 %v376_v31, %v346_v19  ;;  %v400_v36 = vadd.f32 %v399_v33, %v393_v29 }
 0x108   : > { %v378_v37 = vadd.f32 %v538_v13, %v377_v34  ;;  %v401_v39 = vadd.f32 %v400_v36, %v394_v32 }
 0x10a   : > { %v379_v40 = vadd.f32 %v539_v17, %v378_v37  ;;  %v402_v41 = vadd.f32 %v401_v39, %v395_v35 }
 0x10c   : > { %v380_v42 = vrot.slane %v379_v40, 4  ;;  %v403_v43 = vadd.f32 %v402_v41, %v396_v38 }
 0x10e   : > { %v381_v44 = vadd.f32 %v380_v42, %v379_v40  ;;  %v404_v45 = vrot.slane %v403_v43, 4 }
 0x110   : > { %v382_v46 = vrot.slane %v381_v44, 2  ;;  %v405_v47 = vadd.f32 %v404_v45, %v403_v43 }
 0x112   : > { %v383_v48 = vadd.f32 %v382_v46, %v381_v44  ;;  %v406_v49 = vrot.slane %v405_v47, 2 }
 0x114   : > { %v384_v50 = vrot.slane %v383_v48, 1  ;;  %v407_v51 = vadd.f32 %v406_v49, %v405_v47 }
 0x116   : > { %v385_v53 = vadd.f32 %v384_v50, %v383_v48  ;;  %v408_v54 = vrot.slane %v407_v51, 1 }
 0x118   : > { %v386_v56 = vadd.f32 %v385_v53, %v372_v52  ;;  %v409_v57 = vadd.f32 %v408_v54, %v407_v51 }
 0x11a   : > { %387 = vst [vmem:[%s687_s3] sm:$0x1] %v386_v56  ;;  %v410_v58 = vadd.f32 %v409_v57, %v388_v55 }
 0x11c   : > { %411 = vst [vmem:[%s688_s4] sm:$0x1] %v410_v58 }
 0x11d PF: > { %s15_s15 = sadd.s32 1, %s583_s15  }
 0x11e   : > { %p12_p5 = scmp.ge.s32.totalorder %s15_s15, 4  }
 0x120   :  { %14 = sbr.rel (!%p12_p5) target bundleno = 1 (0x1), region = 78 }

</bundles_post_ra>
